<compile_context>
chip_gen: v7x
topology: tpu7x:2x2x1
jax: 0.10.0
libtpu: 0.0.40
codegen_flags: <defaults>
</compile_context>

<pallas_src>
import jax
import jax.numpy as jnp
import numpy as np
from jax import lax
from jax.experimental import pallas as pl
from jax.experimental.pallas import tpu as pltpu

NEG_SLOPE = 0.2
EPS = 1e-5


def _leaky(x):
    return jnp.where(x >= 0, x, NEG_SLOPE * x)


def _make_hin_kernel(H, W, cout):
    HW = H * W
    half = cout // 2

    def kernel(x_ref, w1_ref, b1_ref, g_ref, bt_ref, w2_ref, b2_ref, o_ref):
        # x_ref : (1, Cin, HW) f32        o_ref : (1, Cout, HW) f32
        # w1_ref: (2*Cout, 9*Cin) bf16    (conv_1 rows, then fused 1x1 identity rows)
        # w2_ref: (Cout, 9*Cout) bf16
        # b1_ref: (2*Cout, 1) f32         g/bt : (Cout//2, 1) f32   b2: (Cout, 1) f32
        wcol = lax.broadcasted_iota(jnp.int32, (1, HW), 1) % W  # pixel column
        left_ok = wcol >= 1          # kx = 0 tap in range (hoisted, reused)
        right_ok = wcol <= W - 2     # kx = 2 tap in range

        def im2col(a_f32):
            """(C, HW) f32 -> (9*C, HW) bf16 im2col slab, tap-major rows."""
            a = a_f32.astype(jnp.bfloat16)           # build the slab in bf16
            pad = W + 1
            zpad = jnp.zeros((a.shape[0], pad), jnp.bfloat16)
            af = jnp.concatenate([zpad, a, zpad], axis=1)   # zero halo, flat
            taps = []
            for ky in range(3):
                for kx in range(3):
                    s = (ky - 1) * W + (kx - 1)       # flat source shift
                    t = af[:, pad + s: pad + s + HW]  # static lane slice
                    if kx == 0:                       # w-1 wraps -> zero it
                        t = jnp.where(left_ok, t, 0.0)
                    elif kx == 2:                     # w+1 wraps -> zero it
                        t = jnp.where(right_ok, t, 0.0)
                    taps.append(t)
            return jnp.concatenate(taps, axis=0)

        x = x_ref[0]                                  # (Cin, HW) f32

        # ---- conv_1 + fused 1x1 identity: ONE MXU matmul, 2*Cout rows ----
        full = jnp.dot(w1_ref[...], im2col(x),
                       preferred_element_type=jnp.float32) + b1_ref[...]
        acc1 = full[:cout]                            # conv_1 output (Cout, HW)
        ident = full[cout:]                           # identity branch (Cout, HW)

        # ---- half instance norm: stats/affine on first Cout//2 channels only
        h1 = acc1[:half]                              # (half, HW) f32
        inv_hw = jnp.float32(1.0 / HW)
        mean = jnp.sum(h1, axis=1, keepdims=True) * inv_hw
        ex2 = jnp.sum(h1 * h1, axis=1, keepdims=True) * inv_hw
        var = jnp.maximum(ex2 - mean * mean, 0.0)     # one-pass variance (f32)
        normed = (h1 - mean) * lax.rsqrt(var + EPS) * g_ref[...] + bt_ref[...]
        out = jnp.concatenate([normed, acc1[half:]], axis=0)  # sublane concat
        out = _leaky(out)                             # relu_1

        # ---- conv_2: 3x3 SAME, one matmul, then relu_2 ----
        acc2 = jnp.dot(w2_ref[...], im2col(out),
                       preferred_element_type=jnp.float32) + b2_ref[...]
        acc2 = _leaky(acc2)

        o_ref[0] = (acc2 + ident).astype(o_ref.dtype)  # lane-dense store

    return kernel


def hin_forward(x_nchw, kp):
    """x_nchw: (B, Cin, H, W) float32; kp: kernel-layout params (prep_params)."""
    B, cin, H, W = x_nchw.shape
    HW = H * W
    cout = kp["w1_aug"].shape[0] // 2
    half = cout // 2
    x_flat = x_nchw.reshape(B, cin, HW)

    # Explicit VMEM budget: bf16 im2col slabs + live f32 activations +
    # double-buffered I/O blocks, with headroom, clamped to a safe range.
    slab_bytes = 9 * (cin + cout) * HW * 2                     # two bf16 slabs
    live_f32 = (cin + 2 * cout + 3 * cout) * HW * 4            # x, full, out/acc2/ident
    io_blocks = 2 * (cin + cout) * HW * 4                      # double-buffered blocks
    est = slab_bytes + live_f32 + io_blocks + (2 << 20)
    vmem_limit = int(min(max(2 * est, 32 << 20), 100 << 20))

    flops = 2 * B * HW * (2 * cout * 9 * cin + cout * 9 * cout)
    bytes_accessed = (x_flat.size * 4 + B * cout * HW * 4 +
                      kp["w1_aug"].size * 2 + kp["w2_mat"].size * 2 +
                      (3 * cout + 2 * half) * 4)

    out_flat = pl.pallas_call(
        _make_hin_kernel(H, W, cout),
        out_shape=jax.ShapeDtypeStruct((B, cout, HW), jnp.float32),
        grid_spec=pltpu.PrefetchScalarGridSpec(
            num_scalar_prefetch=0,
            grid=(B,),
            in_specs=[
                pl.BlockSpec((1, cin, HW), lambda b: (b, 0, 0)),       # x
                pl.BlockSpec((2 * cout, 9 * cin), lambda b: (0, 0)),   # w1 (+ fused id)
                pl.BlockSpec((2 * cout, 1), lambda b: (0, 0)),         # b1 (+ bid)
                pl.BlockSpec((half, 1), lambda b: (0, 0)),             # gamma
                pl.BlockSpec((half, 1), lambda b: (0, 0)),             # beta
                pl.BlockSpec((cout, 9 * cout), lambda b: (0, 0)),      # w2
                pl.BlockSpec((cout, 1), lambda b: (0, 0)),             # b2
            ],
            out_specs=pl.BlockSpec((1, cout, HW), lambda b: (b, 0, 0)),
        ),
        compiler_params=pltpu.CompilerParams(
            dimension_semantics=("parallel",),        # batch items independent
            vmem_limit_bytes=vmem_limit),
        cost_estimate=pl.CostEstimate(
            flops=flops, transcendentals=B * half,
            bytes_accessed=bytes_accessed),
    )(x_flat, kp["w1_aug"], kp["b1_aug"], kp["gamma"], kp["beta"],
      kp["w2_mat"], kp["b2"])
    return out_flat.reshape(B, cout, H, W)


def ref_forward(x, p, matmul_dtype=jnp.float32):
    """Pure-JAX NCHW reference mirroring the PyTorch forward.

    matmul_dtype=bfloat16 emulates the kernel's bf16 MXU inputs (f32 accum).
    """
    dn = ("NCHW", "OIHW", "NCHW")
    cast = lambda a: a.astype(matmul_dtype).astype(jnp.float32)
    bc = lambda v: v[None, :, None, None]
    cout = p["w1"].shape[0]
    half = cout // 2

    out = lax.conv_general_dilated(cast(x), cast(p["w1"]), (1, 1), "SAME",
                                   dimension_numbers=dn) + bc(p["b1"])
    out1, out2 = out[:, :half], out[:, half:]
    mean = jnp.mean(out1, axis=(2, 3), keepdims=True)
    var = jnp.mean((out1 - mean) ** 2, axis=(2, 3), keepdims=True)
    out1 = (out1 - mean) * lax.rsqrt(var + EPS)
    out1 = out1 * bc(p["gamma"]) + bc(p["beta"])
    out = _leaky(jnp.concatenate([out1, out2], axis=1))
    out = lax.conv_general_dilated(cast(out), cast(p["w2"]), (1, 1), "SAME",
                                   dimension_numbers=dn) + bc(p["b2"])
    out = _leaky(out)
    ident = lax.conv_general_dilated(cast(x), cast(p["wid"]), (1, 1), "SAME",
                                     dimension_numbers=dn) + bc(p["bid"])
    return out + ident


def make_params(key, in_size, out_size):
    """Parameters in PyTorch layouts (OIHW weights, 1-D biases)."""
    ks = jax.random.split(key, 8)
    half = out_size // 2
    return {
        "w1": 0.1 * jax.random.normal(ks[0], (out_size, in_size, 3, 3), jnp.float32),
        "b1": 0.1 * jax.random.normal(ks[1], (out_size,), jnp.float32),
        "gamma": 1.0 + 0.1 * jax.random.normal(ks[2], (half,), jnp.float32),
        "beta": 0.1 * jax.random.normal(ks[3], (half,), jnp.float32),
        "w2": 0.1 * jax.random.normal(ks[4], (out_size, out_size, 3, 3), jnp.float32),
        "b2": 0.1 * jax.random.normal(ks[5], (out_size,), jnp.float32),
        "wid": 0.1 * jax.random.normal(ks[6], (out_size, in_size, 1, 1), jnp.float32),
        "bid": 0.1 * jax.random.normal(ks[7], (out_size,), jnp.float32),
    }


def prep_params(p):
    """Convert PyTorch-layout params to the kernel's fused matmul layouts."""
    cout, cin = p["w1"].shape[0], p["w1"].shape[1]
    half = cout // 2
    # im2col row order is k*Cin + ci with k = ky*3 + kx (tap-major).
    w1_mat = jnp.transpose(p["w1"], (2, 3, 1, 0)).reshape(9 * cin, cout).T
    w2_mat = jnp.transpose(p["w2"], (2, 3, 1, 0)).reshape(9 * cout, cout).T
    wid_mat = p["wid"][:, :, 0, 0]                              # (cout, cin)
    # Fuse the 1x1 identity conv into conv_1's matmul: Cout extra rows that are
    # zero except at the centre-tap columns (k = 4 -> columns 4*Cin..5*Cin-1).
    wid_rows = jnp.zeros((cout, 9 * cin), jnp.float32)
    wid_rows = wid_rows.at[:, 4 * cin:5 * cin].set(wid_mat)
    w1_aug = jnp.concatenate([w1_mat, wid_rows], axis=0)        # (2*cout, 9*cin)
    b1_aug = jnp.concatenate([p["b1"], p["bid"]]).reshape(2 * cout, 1)
    return {
        "w1_aug": w1_aug.astype(jnp.bfloat16),
        "w2_mat": w2_mat.astype(jnp.bfloat16),
        "b1_aug": b1_aug,
        "b2": p["b2"].reshape(cout, 1),
        "gamma": p["gamma"].reshape(half, 1),
        "beta": p["beta"].reshape(half, 1),
    }


if __name__ == "__main__":
    B, H, W = 2, 16, 16
    in_size, out_size = 4, 8

    key = jax.random.PRNGKey(0)
    kx, kp = jax.random.split(key)
    x = jax.random.normal(kx, (B, in_size, H, W), jnp.float32)  # NCHW like PyTorch
    torch_params = make_params(kp, in_size, out_size)
    kernel_params = prep_params(torch_params)

    out = jax.block_until_ready(hin_forward(x, kernel_params))

    # Tight check vs a reference that emulates the kernel's bf16 matmul inputs
    # (f32 accumulation / f32 instance-norm stats): validates structure exactly.
    ref_bf16 = jax.block_until_ready(ref_forward(x, torch_params, jnp.bfloat16))
    np.testing.assert_allclose(np.asarray(out), np.asarray(ref_bf16),
                               rtol=2e-3, atol=2e-3)

    # Loose check vs the exact float32 PyTorch-equivalent forward (bf16 matmul
    # rounding is the only approximation).
    ref_f32 = jax.block_until_ready(ref_forward(x, torch_params, jnp.float32))
    np.testing.assert_allclose(np.asarray(out), np.asarray(ref_f32),
                               rtol=5e-2, atol=5e-2)
    print("KERNEL_OK")
</pallas_src>

<mosaic_0001>
module attributes {stable_mosaic.version = 11 : i64} {
  func.func @kernel(%arg0: i32, %arg1: memref<1x4x256xf32, #tpu.memory_space<vmem>>, %arg2: memref<16x36xbf16, #tpu.memory_space<vmem>>, %arg3: memref<16x1xf32, #tpu.memory_space<vmem>>, %arg4: memref<4x1xf32, #tpu.memory_space<vmem>>, %arg5: memref<4x1xf32, #tpu.memory_space<vmem>>, %arg6: memref<8x72xbf16, #tpu.memory_space<vmem>>, %arg7: memref<8x1xf32, #tpu.memory_space<vmem>>, %arg8: memref<1x8x256xf32, #tpu.memory_space<vmem>>) attributes {dimension_semantics = [#tpu.dimension_semantics<parallel>], iteration_bounds = array<i64: 2>, scalar_prefetch = 0 : i64, scratch_operands = 0 : i64, tpu.core_type = #tpu.core_type<tc>, window_params = [{transform_indices = @transform_0, window_bounds = array<i64: 1, 4, 256>}, {pipeline_mode = #tpu.pipeline_mode<synchronous>, transform_indices = @transform_1, window_bounds = array<i64: 16, 36>}, {pipeline_mode = #tpu.pipeline_mode<synchronous>, transform_indices = @transform_2, window_bounds = array<i64: 16, 1>}, {pipeline_mode = #tpu.pipeline_mode<synchronous>, transform_indices = @transform_3, window_bounds = array<i64: 4, 1>}, {pipeline_mode = #tpu.pipeline_mode<synchronous>, transform_indices = @transform_4, window_bounds = array<i64: 4, 1>}, {pipeline_mode = #tpu.pipeline_mode<synchronous>, transform_indices = @transform_5, window_bounds = array<i64: 8, 72>}, {pipeline_mode = #tpu.pipeline_mode<synchronous>, transform_indices = @transform_6, window_bounds = array<i64: 8, 1>}, {transform_indices = @transform_7, window_bounds = array<i64: 1, 8, 256>}]} {
    %0 = tpu.iota {dimensions = array<i32: 1>} : vector<1x256xi32>
    %c16_i32 = arith.constant 16 : i32
    %c0_i32 = arith.constant 0 : i32
    %1 = arith.cmpi eq, %c16_i32, %c0_i32 : i32
    %c1_i32 = arith.constant 1 : i32
    %2 = arith.select %1, %c1_i32, %c16_i32 : i32
    %3 = vector.broadcast %2 : i32 to vector<1x256xi32>
    %4 = arith.remsi %0, %3 : vector<1x256xi32>
    %c0_i32_0 = arith.constant 0 : i32
    %5 = vector.broadcast %c0_i32_0 : i32 to vector<1x256xi32>
    %6 = arith.cmpi ne, %4, %5 : vector<1x256xi32>
    %c0_i32_1 = arith.constant 0 : i32
    %7 = vector.broadcast %c0_i32_1 : i32 to vector<1x256xi32>
    %8 = arith.cmpi slt, %4, %7 : vector<1x256xi32>
    %c0_i32_2 = arith.constant 0 : i32
    %9 = arith.cmpi slt, %2, %c0_i32_2 : i32
    %10 = vector.broadcast %9 : i1 to vector<1x256xi1>
    %11 = vector.broadcast %10 : vector<1x256xi1> to vector<1x256xi1>
    %12 = arith.xori %8, %11 : vector<1x256xi1>
    %13 = arith.andi %12, %6 : vector<1x256xi1>
    %14 = vector.broadcast %2 : i32 to vector<1x256xi32>
    %15 = arith.addi %4, %14 : vector<1x256xi32>
    %16 = arith.select %13, %15, %4 : vector<1x256xi1>, vector<1x256xi32>
    %c1_i32_3 = arith.constant 1 : i32
    %17 = vector.broadcast %c1_i32_3 : i32 to vector<1x256xi32>
    %18 = arith.cmpi sge, %16, %17 : vector<1x256xi32>
    %c14_i32 = arith.constant 14 : i32
    %19 = vector.broadcast %c14_i32 : i32 to vector<1x256xi32>
    %20 = arith.cmpi sle, %16, %19 : vector<1x256xi32>
    %c0 = arith.constant 0 : index
    %c0_4 = arith.constant 0 : index
    %c0_5 = arith.constant 0 : index
    %21 = vector.load %arg1[%c0, %c0_4, %c0_5] : memref<1x4x256xf32, #tpu.memory_space<vmem>>, vector<1x4x256xf32>
    %22 = vector.shape_cast %21 : vector<1x4x256xf32> to vector<4x256xf32>
    %c0_6 = arith.constant 0 : index
    %c0_7 = arith.constant 0 : index
    %23 = vector.load %arg2[%c0_6, %c0_7] : memref<16x36xbf16, #tpu.memory_space<vmem>>, vector<16x36xbf16>
    %24 = arith.truncf %22 : vector<4x256xf32> to vector<4x256xbf16>
    %cst = arith.constant 0.000000e+00 : bf16
    %25 = vector.broadcast %cst : bf16 to vector<4x17xbf16>
    %26 = tpu.concatenate %25, %24, %25 in 1 : vector<4x17xbf16>, vector<4x256xbf16>, vector<4x17xbf16> -> vector<4x290xbf16>
    %27 = vector.extract_strided_slice %26 {offsets = [0, 0], sizes = [4, 256], strides = [1, 1]} : vector<4x290xbf16> to vector<4x256xbf16>
    %cst_8 = arith.constant 0.000000e+00 : f32
    %28 = arith.truncf %cst_8 : f32 to bf16
    %29 = vector.shape_cast %18 : vector<1x256xi1> to vector<1x256xi1>
    %30 = vector.broadcast %29 : vector<1x256xi1> to vector<4x256xi1>
    %31 = vector.broadcast %28 : bf16 to vector<4x256xbf16>
    %32 = arith.select %30, %27, %31 : vector<4x256xi1>, vector<4x256xbf16>
    %33 = vector.extract_strided_slice %26 {offsets = [0, 1], sizes = [4, 256], strides = [1, 1]} : vector<4x290xbf16> to vector<4x256xbf16>
    %34 = vector.extract_strided_slice %26 {offsets = [0, 2], sizes = [4, 256], strides = [1, 1]} : vector<4x290xbf16> to vector<4x256xbf16>
    %cst_9 = arith.constant 0.000000e+00 : f32
    %35 = arith.truncf %cst_9 : f32 to bf16
    %36 = vector.shape_cast %20 : vector<1x256xi1> to vector<1x256xi1>
    %37 = vector.broadcast %36 : vector<1x256xi1> to vector<4x256xi1>
    %38 = vector.broadcast %35 : bf16 to vector<4x256xbf16>
    %39 = arith.select %37, %34, %38 : vector<4x256xi1>, vector<4x256xbf16>
    %40 = vector.extract_strided_slice %26 {offsets = [0, 16], sizes = [4, 256], strides = [1, 1]} : vector<4x290xbf16> to vector<4x256xbf16>
    %cst_10 = arith.constant 0.000000e+00 : f32
    %41 = arith.truncf %cst_10 : f32 to bf16
    %42 = vector.shape_cast %18 : vector<1x256xi1> to vector<1x256xi1>
    %43 = vector.broadcast %42 : vector<1x256xi1> to vector<4x256xi1>
    %44 = vector.broadcast %41 : bf16 to vector<4x256xbf16>
    %45 = arith.select %43, %40, %44 : vector<4x256xi1>, vector<4x256xbf16>
    %46 = vector.extract_strided_slice %26 {offsets = [0, 17], sizes = [4, 256], strides = [1, 1]} : vector<4x290xbf16> to vector<4x256xbf16>
    %47 = vector.extract_strided_slice %26 {offsets = [0, 18], sizes = [4, 256], strides = [1, 1]} : vector<4x290xbf16> to vector<4x256xbf16>
    %cst_11 = arith.constant 0.000000e+00 : f32
    %48 = arith.truncf %cst_11 : f32 to bf16
    %49 = vector.shape_cast %20 : vector<1x256xi1> to vector<1x256xi1>
    %50 = vector.broadcast %49 : vector<1x256xi1> to vector<4x256xi1>
    %51 = vector.broadcast %48 : bf16 to vector<4x256xbf16>
    %52 = arith.select %50, %47, %51 : vector<4x256xi1>, vector<4x256xbf16>
    %53 = vector.extract_strided_slice %26 {offsets = [0, 32], sizes = [4, 256], strides = [1, 1]} : vector<4x290xbf16> to vector<4x256xbf16>
    %cst_12 = arith.constant 0.000000e+00 : f32
    %54 = arith.truncf %cst_12 : f32 to bf16
    %55 = vector.shape_cast %18 : vector<1x256xi1> to vector<1x256xi1>
    %56 = vector.broadcast %55 : vector<1x256xi1> to vector<4x256xi1>
    %57 = vector.broadcast %54 : bf16 to vector<4x256xbf16>
    %58 = arith.select %56, %53, %57 : vector<4x256xi1>, vector<4x256xbf16>
    %59 = vector.extract_strided_slice %26 {offsets = [0, 33], sizes = [4, 256], strides = [1, 1]} : vector<4x290xbf16> to vector<4x256xbf16>
    %60 = vector.extract_strided_slice %26 {offsets = [0, 34], sizes = [4, 256], strides = [1, 1]} : vector<4x290xbf16> to vector<4x256xbf16>
    %cst_13 = arith.constant 0.000000e+00 : f32
    %61 = arith.truncf %cst_13 : f32 to bf16
    %62 = vector.shape_cast %20 : vector<1x256xi1> to vector<1x256xi1>
    %63 = vector.broadcast %62 : vector<1x256xi1> to vector<4x256xi1>
    %64 = vector.broadcast %61 : bf16 to vector<4x256xbf16>
    %65 = arith.select %63, %60, %64 : vector<4x256xi1>, vector<4x256xbf16>
    %66 = tpu.concatenate %32, %33, %39, %45, %46, %52, %58, %59, %65 in 0 : vector<4x256xbf16>, vector<4x256xbf16>, vector<4x256xbf16>, vector<4x256xbf16>, vector<4x256xbf16>, vector<4x256xbf16>, vector<4x256xbf16>, vector<4x256xbf16>, vector<4x256xbf16> -> vector<36x256xbf16>
    %cst_14 = arith.constant dense<0.000000e+00> : vector<16x256xf32>
    %67 = tpu.matmul %23, %66, %cst_14 {dimension_numbers = #tpu.dot_dimension_numbers<[1], [0], [0], [1], [0, 0, 1, 1], [], []>} : vector<16x36xbf16>, vector<36x256xbf16>, vector<16x256xf32> -> vector<16x256xf32>
    %c0_15 = arith.constant 0 : index
    %c0_16 = arith.constant 0 : index
    %68 = vector.load %arg3[%c0_15, %c0_16] : memref<16x1xf32, #tpu.memory_space<vmem>>, vector<16x1xf32>
    %69 = vector.broadcast %68 : vector<16x1xf32> to vector<16x256xf32>
    %70 = arith.addf %67, %69 : vector<16x256xf32>
    %71 = vector.extract_strided_slice %70 {offsets = [0, 0], sizes = [8, 256], strides = [1, 1]} : vector<16x256xf32> to vector<8x256xf32>
    %72 = vector.extract_strided_slice %70 {offsets = [8, 0], sizes = [8, 256], strides = [1, 1]} : vector<16x256xf32> to vector<8x256xf32>
    %73 = vector.extract_strided_slice %71 {offsets = [0, 0], sizes = [4, 256], strides = [1, 1]} : vector<8x256xf32> to vector<4x256xf32>
    %cst_17 = arith.constant dense<0.000000e+00> : vector<4xf32>
    %74 = vector.multi_reduction <add>, %73, %cst_17 [1] : vector<4x256xf32> to vector<4xf32>
    %75 = vector.shape_cast %74 : vector<4xf32> to vector<4x1xf32>
    %cst_18 = arith.constant 3.906250e-03 : f32
    %76 = vector.broadcast %cst_18 : f32 to vector<4x1xf32>
    %77 = arith.mulf %75, %76 : vector<4x1xf32>
    %78 = arith.mulf %73, %73 : vector<4x256xf32>
    %cst_19 = arith.constant dense<0.000000e+00> : vector<4xf32>
    %79 = vector.multi_reduction <add>, %78, %cst_19 [1] : vector<4x256xf32> to vector<4xf32>
    %80 = vector.shape_cast %79 : vector<4xf32> to vector<4x1xf32>
    %cst_20 = arith.constant 3.906250e-03 : f32
    %81 = vector.broadcast %cst_20 : f32 to vector<4x1xf32>
    %82 = arith.mulf %80, %81 : vector<4x1xf32>
    %83 = arith.mulf %77, %77 : vector<4x1xf32>
    %84 = arith.subf %82, %83 : vector<4x1xf32>
    %cst_21 = arith.constant 0.000000e+00 : f32
    %85 = vector.broadcast %cst_21 : f32 to vector<4x1xf32>
    %86 = arith.maximumf %84, %85 : vector<4x1xf32>
    %87 = vector.broadcast %77 : vector<4x1xf32> to vector<4x256xf32>
    %88 = arith.subf %73, %87 : vector<4x256xf32>
    %cst_22 = arith.constant 9.99999974E-6 : f32
    %89 = vector.broadcast %cst_22 : f32 to vector<4x1xf32>
    %90 = arith.addf %86, %89 : vector<4x1xf32>
    %91 = math.rsqrt %90 : vector<4x1xf32>
    %92 = vector.broadcast %91 : vector<4x1xf32> to vector<4x256xf32>
    %93 = arith.mulf %88, %92 : vector<4x256xf32>
    %c0_23 = arith.constant 0 : index
    %c0_24 = arith.constant 0 : index
    %94 = vector.load %arg4[%c0_23, %c0_24] : memref<4x1xf32, #tpu.memory_space<vmem>>, vector<4x1xf32>
    %95 = vector.broadcast %94 : vector<4x1xf32> to vector<4x256xf32>
    %96 = arith.mulf %93, %95 : vector<4x256xf32>
    %c0_25 = arith.constant 0 : index
    %c0_26 = arith.constant 0 : index
    %97 = vector.load %arg5[%c0_25, %c0_26] : memref<4x1xf32, #tpu.memory_space<vmem>>, vector<4x1xf32>
    %98 = vector.broadcast %97 : vector<4x1xf32> to vector<4x256xf32>
    %99 = arith.addf %96, %98 : vector<4x256xf32>
    %100 = vector.extract_strided_slice %71 {offsets = [4, 0], sizes = [4, 256], strides = [1, 1]} : vector<8x256xf32> to vector<4x256xf32>
    %101 = tpu.concatenate %99, %100 in 0 : vector<4x256xf32>, vector<4x256xf32> -> vector<8x256xf32>
    %cst_27 = arith.constant 0.000000e+00 : f32
    %102 = vector.broadcast %cst_27 : f32 to vector<8x256xf32>
    %103 = arith.cmpf oge, %101, %102 : vector<8x256xf32>
    %cst_28 = arith.constant 2.000000e-01 : f32
    %104 = vector.broadcast %cst_28 : f32 to vector<8x256xf32>
    %105 = arith.mulf %104, %101 : vector<8x256xf32>
    %106 = arith.select %103, %101, %105 : vector<8x256xi1>, vector<8x256xf32>
    %c0_29 = arith.constant 0 : index
    %c0_30 = arith.constant 0 : index
    %107 = vector.load %arg6[%c0_29, %c0_30] : memref<8x72xbf16, #tpu.memory_space<vmem>>, vector<8x72xbf16>
    %108 = arith.truncf %106 : vector<8x256xf32> to vector<8x256xbf16>
    %cst_31 = arith.constant 0.000000e+00 : bf16
    %109 = vector.broadcast %cst_31 : bf16 to vector<8x17xbf16>
    %110 = tpu.concatenate %109, %108, %109 in 1 : vector<8x17xbf16>, vector<8x256xbf16>, vector<8x17xbf16> -> vector<8x290xbf16>
    %111 = vector.extract_strided_slice %110 {offsets = [0, 0], sizes = [8, 256], strides = [1, 1]} : vector<8x290xbf16> to vector<8x256xbf16>
    %cst_32 = arith.constant 0.000000e+00 : f32
    %112 = arith.truncf %cst_32 : f32 to bf16
    %113 = vector.shape_cast %18 : vector<1x256xi1> to vector<1x256xi1>
    %114 = vector.broadcast %113 : vector<1x256xi1> to vector<8x256xi1>
    %115 = vector.broadcast %112 : bf16 to vector<8x256xbf16>
    %116 = arith.select %114, %111, %115 : vector<8x256xi1>, vector<8x256xbf16>
    %117 = vector.extract_strided_slice %110 {offsets = [0, 1], sizes = [8, 256], strides = [1, 1]} : vector<8x290xbf16> to vector<8x256xbf16>
    %118 = vector.extract_strided_slice %110 {offsets = [0, 2], sizes = [8, 256], strides = [1, 1]} : vector<8x290xbf16> to vector<8x256xbf16>
    %cst_33 = arith.constant 0.000000e+00 : f32
    %119 = arith.truncf %cst_33 : f32 to bf16
    %120 = vector.shape_cast %20 : vector<1x256xi1> to vector<1x256xi1>
    %121 = vector.broadcast %120 : vector<1x256xi1> to vector<8x256xi1>
    %122 = vector.broadcast %119 : bf16 to vector<8x256xbf16>
    %123 = arith.select %121, %118, %122 : vector<8x256xi1>, vector<8x256xbf16>
    %124 = vector.extract_strided_slice %110 {offsets = [0, 16], sizes = [8, 256], strides = [1, 1]} : vector<8x290xbf16> to vector<8x256xbf16>
    %cst_34 = arith.constant 0.000000e+00 : f32
    %125 = arith.truncf %cst_34 : f32 to bf16
    %126 = vector.shape_cast %18 : vector<1x256xi1> to vector<1x256xi1>
    %127 = vector.broadcast %126 : vector<1x256xi1> to vector<8x256xi1>
    %128 = vector.broadcast %125 : bf16 to vector<8x256xbf16>
    %129 = arith.select %127, %124, %128 : vector<8x256xi1>, vector<8x256xbf16>
    %130 = vector.extract_strided_slice %110 {offsets = [0, 17], sizes = [8, 256], strides = [1, 1]} : vector<8x290xbf16> to vector<8x256xbf16>
    %131 = vector.extract_strided_slice %110 {offsets = [0, 18], sizes = [8, 256], strides = [1, 1]} : vector<8x290xbf16> to vector<8x256xbf16>
    %cst_35 = arith.constant 0.000000e+00 : f32
    %132 = arith.truncf %cst_35 : f32 to bf16
    %133 = vector.shape_cast %20 : vector<1x256xi1> to vector<1x256xi1>
    %134 = vector.broadcast %133 : vector<1x256xi1> to vector<8x256xi1>
    %135 = vector.broadcast %132 : bf16 to vector<8x256xbf16>
    %136 = arith.select %134, %131, %135 : vector<8x256xi1>, vector<8x256xbf16>
    %137 = vector.extract_strided_slice %110 {offsets = [0, 32], sizes = [8, 256], strides = [1, 1]} : vector<8x290xbf16> to vector<8x256xbf16>
    %cst_36 = arith.constant 0.000000e+00 : f32
    %138 = arith.truncf %cst_36 : f32 to bf16
    %139 = vector.shape_cast %18 : vector<1x256xi1> to vector<1x256xi1>
    %140 = vector.broadcast %139 : vector<1x256xi1> to vector<8x256xi1>
    %141 = vector.broadcast %138 : bf16 to vector<8x256xbf16>
    %142 = arith.select %140, %137, %141 : vector<8x256xi1>, vector<8x256xbf16>
    %143 = vector.extract_strided_slice %110 {offsets = [0, 33], sizes = [8, 256], strides = [1, 1]} : vector<8x290xbf16> to vector<8x256xbf16>
    %144 = vector.extract_strided_slice %110 {offsets = [0, 34], sizes = [8, 256], strides = [1, 1]} : vector<8x290xbf16> to vector<8x256xbf16>
    %cst_37 = arith.constant 0.000000e+00 : f32
    %145 = arith.truncf %cst_37 : f32 to bf16
    %146 = vector.shape_cast %20 : vector<1x256xi1> to vector<1x256xi1>
    %147 = vector.broadcast %146 : vector<1x256xi1> to vector<8x256xi1>
    %148 = vector.broadcast %145 : bf16 to vector<8x256xbf16>
    %149 = arith.select %147, %144, %148 : vector<8x256xi1>, vector<8x256xbf16>
    %150 = tpu.concatenate %116, %117, %123, %129, %130, %136, %142, %143, %149 in 0 : vector<8x256xbf16>, vector<8x256xbf16>, vector<8x256xbf16>, vector<8x256xbf16>, vector<8x256xbf16>, vector<8x256xbf16>, vector<8x256xbf16>, vector<8x256xbf16>, vector<8x256xbf16> -> vector<72x256xbf16>
    %cst_38 = arith.constant dense<0.000000e+00> : vector<8x256xf32>
    %151 = tpu.matmul %107, %150, %cst_38 {dimension_numbers = #tpu.dot_dimension_numbers<[1], [0], [0], [1], [0, 0, 1, 1], [], []>} : vector<8x72xbf16>, vector<72x256xbf16>, vector<8x256xf32> -> vector<8x256xf32>
    %c0_39 = arith.constant 0 : index
    %c0_40 = arith.constant 0 : index
    %152 = vector.load %arg7[%c0_39, %c0_40] : memref<8x1xf32, #tpu.memory_space<vmem>>, vector<8x1xf32>
    %153 = vector.broadcast %152 : vector<8x1xf32> to vector<8x256xf32>
    %154 = arith.addf %151, %153 : vector<8x256xf32>
    %cst_41 = arith.constant 0.000000e+00 : f32
    %155 = vector.broadcast %cst_41 : f32 to vector<8x256xf32>
    %156 = arith.cmpf oge, %154, %155 : vector<8x256xf32>
    %cst_42 = arith.constant 2.000000e-01 : f32
    %157 = vector.broadcast %cst_42 : f32 to vector<8x256xf32>
    %158 = arith.mulf %157, %154 : vector<8x256xf32>
    %159 = arith.select %156, %154, %158 : vector<8x256xi1>, vector<8x256xf32>
    %160 = arith.addf %159, %72 : vector<8x256xf32>
    %c0_43 = arith.constant 0 : index
    %c0_44 = arith.constant 0 : index
    %c0_45 = arith.constant 0 : index
    %161 = vector.load %arg8[%c0_43, %c0_44, %c0_45] : memref<1x8x256xf32, #tpu.memory_space<vmem>>, vector<1x8x256xf32>
    %162 = vector.shape_cast %161 : vector<1x8x256xf32> to vector<8x256xf32>
    %163 = vector.shape_cast %160 : vector<8x256xf32> to vector<1x8x256xf32>
    tpu.vector_store %arg8[%c0_43, %c0_44, %c0_45], %163 {strides = array<i32>} : memref<1x8x256xf32, #tpu.memory_space<vmem>>, vector<1x8x256xf32>,
    return
  }
  func.func @transform_0(%arg0: i32) -> (i32, i32, i32) {
    %c0_i32 = arith.constant 0 : i32
    %c0_i32_0 = arith.constant 0 : i32
    %c0_i32_1 = arith.constant 0 : i32
    return %arg0, %c0_i32, %c0_i32_0 : i32, i32, i32
  }
  func.func @transform_1(%arg0: i32) -> (i32, i32) {
    %c0_i32 = arith.constant 0 : i32
    %c0_i32_0 = arith.constant 0 : i32
    %c0_i32_1 = arith.constant 0 : i32
    return %c0_i32, %c0_i32_0 : i32, i32
  }
  func.func @transform_2(%arg0: i32) -> (i32, i32) {
    %c0_i32 = arith.constant 0 : i32
    %c0_i32_0 = arith.constant 0 : i32
    %c0_i32_1 = arith.constant 0 : i32
    return %c0_i32, %c0_i32_0 : i32, i32
  }
  func.func @transform_3(%arg0: i32) -> (i32, i32) {
    %c0_i32 = arith.constant 0 : i32
    %c0_i32_0 = arith.constant 0 : i32
    %c0_i32_1 = arith.constant 0 : i32
    return %c0_i32, %c0_i32_0 : i32, i32
  }
  func.func @transform_4(%arg0: i32) -> (i32, i32) {
    %c0_i32 = arith.constant 0 : i32
    %c0_i32_0 = arith.constant 0 : i32
    %c0_i32_1 = arith.constant 0 : i32
    return %c0_i32, %c0_i32_0 : i32, i32
  }
  func.func @transform_5(%arg0: i32) -> (i32, i32) {
    %c0_i32 = arith.constant 0 : i32
    %c0_i32_0 = arith.constant 0 : i32
    %c0_i32_1 = arith.constant 0 : i32
    return %c0_i32, %c0_i32_0 : i32, i32
  }
  func.func @transform_6(%arg0: i32) -> (i32, i32) {
    %c0_i32 = arith.constant 0 : i32
    %c0_i32_0 = arith.constant 0 : i32
    %c0_i32_1 = arith.constant 0 : i32
    return %c0_i32, %c0_i32_0 : i32, i32
  }
  func.func @transform_7(%arg0: i32) -> (i32, i32, i32) {
    %c0_i32 = arith.constant 0 : i32
    %c0_i32_0 = arith.constant 0 : i32
    %c0_i32_1 = arith.constant 0 : i32
    return %arg0, %c0_i32, %c0_i32_0 : i32, i32, i32
  }
}

</mosaic_0001>

<bundles_post_ra>
// kernel: tpu_custom_call.1
= control target key start
LH: loop header
LB: loop body
LE: loop exit
PB: predicated region body
PF: predicated region fallthrough
CT: control target
= control target key end

     0   :  { %12 = vsyncpa [#allocation3], 0  ;;  %s1615_s0 = inlined_call_operand.vmem [shape: f32[2,4,256], index: 0, kind: input, shape index: {}]   ;;  %s1616_s1 = inlined_call_operand.vmem [shape: bf16[16,36], index: 1, kind: input, shape index: {}]   ;;  %s1617_s2 = inlined_call_operand.vmem [shape: f32[16,1], index: 2, kind: input, shape index: {}]   ;;  %s1618_s3 = inlined_call_operand.vmem [shape: f32[4,1], index: 3, kind: input, shape index: {}]   ;;  %s1619_s4 = inlined_call_operand.vmem [shape: f32[4,1], index: 4, kind: input, shape index: {}]   ;;  %s1620_s5 = inlined_call_operand.vmem [shape: bf16[8,72], index: 5, kind: input, shape index: {}]   ;;  %s1621_s6 = inlined_call_operand.vmem [shape: f32[8,1], index: 6, kind: input, shape index: {}]   ;;  %s1622_s7 = inlined_call_operand.hbm [shape: f32[2,8,256], index: 7, kind: output, shape index: {}]  }
   0x1   :  { %14 = vsyncpa [#allocation3 + $0x1], 0  ;;  %s1183_s24 = smov 0   ;;  %s1185_s25 = smov 0  }
   0x2   :  { %s1187_s26 = smov 0   ;;  %s1189_s27 = smov 0  }
   0x3 LB: > { %s1204_s28 = sadd.s32 4294967295, %s1125_s27   ;;  %s984_s29 = sadd.s32 4294967294, %s1125_s27   ;;  %s1125_s27 = sphi %s1189_s27, %s1660_s27   ;;  %s1121_s26 = sphi %s1187_s26, %s1659_s26   ;;  %s1117_s25 = sphi %s1185_s25, %s1658_s25   ;;  %s1113_s24 = sphi %s1183_s24, %s1657_s24  }
   0x4   : > { %s1208_s30 = sadd.s32 1, %s1125_s27   ;;  %s179_s8 = sadd.s32 1, %s1121_s26 }
   0x5   : > { %s176_s9 = ssub.s32 %s1125_s27, %s1208_s30  ;;  %p189_p0 = scmp.ne.s32.totalorder %s1121_s26, %s1117_s25 }
   0x6   : > { %p177_p1 = scmp.eq.s32.totalorder %s176_s9, 0  ;;  %p190_p2 = scmp.eq.s32.totalorder %s1204_s28, 1 }
   0x7   : > { %p195_p3 = scmp.ne.s32.totalorder %s1117_s25, %s1113_s24  ;;  %p196_p4 = scmp.eq.s32.totalorder %s984_s29, 1 }
   0x8   : > { %s1219_s10 = scalar_select %p177_p1, %s1121_s26, %s179_s8  }
   0x9   : > { %p1221_p5 = por %p190_p2, %p189_p0  ;;  %p1225_p6 = por %p196_p4, %p195_p3 }
   0xa   : > { %p987_p7 = scmp.ge.s32.totalorder %s1125_s27, 1  ;;  %p240_p8 = scmp.lt.s32.totalorder %s1125_s27, 3 }
   0xc   : > { %p241_p9 = pnand %p987_p7, %p240_p8 }
   0xd   : > { %p272_p10 = scmp.lt.s32.totalorder (!%p241_p9), %s1204_s28, 1  ;;  %v280_v0 = vlaneseq (!%p241_p9)  ;;  %v1127_v1 = vmov (!%p241_p9), 0   ;;  %s1128_s18 = smov (!%p241_p9), 17   ;;  %vm325_vm6 = vcmask (!%p241_p9), 138240   ;;  %vm372_vm11 = vcmask (!%p241_p9), 15360  }
   0xe   : > { %244 = sbr.rel (%p241_p9) target bundleno = 1221 (0x4c5), region = 48  ;;  %629 = vmatprep.mubr.bf16.mxu0 (!%p241_p9), %v1127_v1  ;;  %1057 = vset.pattern.permute.xlu0 (!%p241_p9), %v1127_v1  ;;  %s1129_s19 = smov (!%p241_p9), 2  }
   0xf   : > { %v281_v2 = vand.u32 (!%p241_p9), 127, %v280_v0  ;;  %1058 = vset.pattern.permute.xlu1 (!%p241_p9), %v1127_v1  ;;  %891 = vmatprep.mubr.bf16.mxu1 (!%p241_p9), %v1127_v1  ;;  %v343_v3 = vshrl.u32 (!%p241_p9), %v280_v0, 7  ;;  %s1130_s20 = smov (!%p241_p9), 16   ;;  %s1131_s21 = smov (!%p241_p9), 18  }
  0x10   : > { %s1132_s22 = smov (!%p241_p9), 32   ;;  %s1133_s23 = smov (!%p241_p9), 34  }
  0x11   : > { %v282_v4 = vadd.s32 (!%p241_p9), 128, %v281_v2  ;;  %v287_v5 = vand.u32 (!%p241_p9), 15, %v281_v2  ;;  %v344_v10 = vsub.s32 (!%p241_p9), 0, %v343_v3  ;;  %v348_v12 = vsub.s32 (!%p241_p9), 4, %v343_v3  ;;  %s1134_s29 = smov (!%p241_p9), 111   ;;  %s1135_s8 = smov (!%p241_p9), 127  }
  0x12   : > { %s1136_s9 = smov (!%p241_p9), 126   ;;  %s1139_s15 = smov (!%p241_p9), 96  }
  0x13   : > { %v294_v7 = vand.u32 (!%p241_p9), 15, %v282_v4  ;;  %vm309_vm0 = vcmp.le.s32.totalorder (!%p241_p9), %v287_v5, 14  ;;  %vm307_vm1 = vcmp.ge.s32.totalorder (!%p241_p9), %v287_v5, 1  ;;  %s1140_s16 = smov (!%p241_p9), 95  }
  0x15   : > { %s273_s13 = scalar_select %p272_p10, %s1204_s28, 1  ;;  %vm310_vm2 = vcmp.le.s32.totalorder %v294_v7, 14  ;;  %vm308_vm3 = vcmp.ge.s32.totalorder %v294_v7, 1 }
  0x16   : > { %vm358_vm4 = vmpackc.low %vm310_vm2, %vm309_vm0  ;;  %vm384_vm0 = vcmask 130048  }
  0x17   : > { %s1001_s14 = sshll.u32 %s273_s13, 3  ;;  %v359_v13 = vsel %vm358_vm4, 65537, %v1127_v1  ;;  %vm340_vm5 = vmpackc.low %vm308_vm3, %vm307_vm1  ;;  %s1137_s13 = smov 112   ;;  %vm396_vm1 = vcmask 146432   ;;  %vm408_vm3 = vcmask 261120  }
  0x18   : > { %s276_s17 = scalar_lea.vmem %s1615_s0, %s1001_s14  ;;  %v363_v14 = vrot.slane %v359_v13, %v344_v10  ;;  %v341_v15 = vsel %vm340_vm5, 65537, %v1127_v1  ;;  %v367_v16 = vrot.slane %v359_v13, %v348_v12  ;;  %s1138_s14 = smov 110  }
  0x19   : > { %v311_v6 = vld [vmem:[%s276_s17] sm:$0xff]  ;;  %v1238_v17 = vrot.slane %v341_v15, %v348_v12  ;;  %v1241_v18 = vrot.slane %v341_v15, %v344_v10  ;;  %s1141_s17 = smov 94  }
  0x1a   : > { %v317_v8 = vpack.c.bf16 %v311_v6, %v311_v6  ;;  %v315_v9 = vcombine.high %v311_v6, %v311_v6  ;;  %368 = vrot.lane.b32.xlu0 %v363_v14, %s1129_s19 }
  0x1c   : > { %321 = vrot.lane.b32.xlu1 %v317_v8, %s1128_s18  ;;  %v318_v11 = vpack.c.bf16 %v315_v9, %v315_v9  ;;  %v570_v8 = vld [vmem:[%s1617_s2] sm:$0xff] }
  0x1e   : > { %370 = vrot.lane.b32.xlu0 %v367_v16, %s1129_s19 }
  0x20   : > { %323 = vrot.lane.b32.xlu1 %v318_v11, %s1128_s18 }
  0x22   : > { %380 = vrot.lane.b32.xlu0 %v1241_v18, %s1130_s20 }
  0x24   : > { %382 = vrot.lane.b32.xlu1 %v1238_v17, %s1130_s20 }
  0x26   : > { %392 = vrot.lane.b32.xlu0 %v363_v14, %s1131_s21 }
  0x28   : > { %394 = vrot.lane.b32.xlu1 %v367_v16, %s1131_s21 }
  0x2a   : > { %404 = vrot.lane.b32.xlu0 %v1241_v18, %s1132_s22 }
  0x2c   : > { %406 = vrot.lane.b32.xlu1 %v1238_v17, %s1132_s22 }
  0x2e   : > { %416 = vrot.lane.b32.xlu0 %v363_v14, %s1133_s23 }
  0x30   : > { %418 = vrot.lane.b32.xlu1 %v367_v16, %s1133_s23 }
  0x8c   : > { %v1252_v22 = vpop.permute.xlu0 %368 }
  0x8d   : > { %vm374_vm7 = vcmp.ne.s16.totalorder %v1252_v22, 0 }
  0x8e   : > { %v322_v19 = vpop.permute.xlu1 %321 }
  0x8f   : > { %v1247_v20 = vsel %vm325_vm6, 0, %v322_v19 }
  0x90   : > { %472 = vrot.lane.b32.xlu1 %v1247_v20, %s1134_s29  ;;  %v430_v21 = vrot.slane %v1247_v20, 6  ;;  %v1265_v27 = vpop.permute.xlu0 %370  ;;  %v377_v29 = vsel %vm374_vm7, %v1247_v20, 0  ;;  %v511_v4 = vrot.slane %v1247_v20, 2 }
  0x91   : > { %vm376_vm8 = vcmp.ne.s16.totalorder %v1265_v27, 0  ;;  %v445_v32 = vrot.slane %v377_v29, 4  ;;  %v1300_v40 = vsel %vm372_vm11, %v1252_v22, %v1265_v27 }
  0x92   : > { %433 = vrot.lane.b32.xlu0 %v430_v21, %s1135_s8  ;;  %v324_v23 = vpop.permute.xlu1 %323  ;;  %vm375_vm14 = vcmp.ne.s16.totalorder %v1300_v40, 0 }
  0x93   : > { %v1256_v24 = vsel %vm325_vm6, %v322_v19, %v324_v23  ;;  %v1259_v25 = vsel %vm325_vm6, %v324_v23, 0 }
  0x94   : > { %474 = vrot.lane.b32.xlu1 %v1256_v24, %s1134_s29  ;;  %v432_v26 = vrot.slane %v1259_v25, 6  ;;  %v431_v30 = vrot.slane %v1256_v24, 6  ;;  %v379_v31 = vsel %vm376_vm8, %v1259_v25, 0  ;;  %v1281_v33 = vpop.permute.xlu0 %380  ;;  %v378_v49 = vsel %vm375_vm14, %v1256_v24, 0 }
  0x95   : > { %vm386_vm10 = vcmp.ne.s16.totalorder %v1281_v33, 0  ;;  %v447_v36 = vrot.slane %v379_v31, 4  ;;  %v446_v53 = vrot.slane %v378_v49, 4  ;;  %v513_v58 = vrot.slane %v1259_v25, 2 }
  0x96   : > { %476 = vrot.lane.b32.xlu0 %v1259_v25, %s1134_s29  ;;  %v1269_v28 = vpop.permute.xlu1 %382  ;;  %v389_v37 = vsel %vm386_vm10, %v1247_v20, 0  ;;  %v512_v0 = vrot.slane %v1256_v24, 2 }
  0x97   : > { %vm388_vm9 = vcmp.ne.s16.totalorder %v1269_v28, 0  ;;  %v460_v41 = vrot.slane %v389_v37, 2  ;;  %v1327_v50 = vsel %vm384_vm0, %v1281_v33, %v1269_v28  ;;  %vm420_vm0 = vcmask 277504  }
  0x98   : > { %437 = vrot.lane.b32.xlu1 %v432_v26, %s1135_s8  ;;  %v391_v34 = vsel %vm388_vm9, %v1259_v25, 0  ;;  %v1295_v39 = vpop.permute.xlu0 %392  ;;  %vm1630_vm4 = vcmp.ne.s16.totalorder %v1327_v50, 0 }
  0x99   : > { %v462_v38 = vrot.slane %v391_v34, 2  ;;  %vm1627_vm13 = vcmp.ne.s16.totalorder %v1295_v39, 0  ;;  %v390_v57 = vsel %vm1630_vm4, %v1256_v24, 0  ;;  %vm547_vm4 = vcmask 1045504  }
  0x9a   : > { %435 = vrot.lane.b32.xlu0 %v431_v30, %s1135_s8  ;;  %v1288_v35 = vpop.permute.xlu1 %394  ;;  %v401_v47 = vsel %vm1627_vm13, %v1247_v20, 0  ;;  %v461_v60 = vrot.slane %v390_v57, 2  ;;  %vm535_vm13 = vcmask 1041408  }
  0x9b   : > { %vm1629_vm12 = vcmp.ne.s16.totalorder %v1288_v35, 0  ;;  %v1332_v51 = vsel %vm396_vm1, %v1295_v39, %v1288_v35  ;;  %v484_v52 = vrot.slane %v401_v47, 6 }
  0x9c   : > { %448 = vrot.lane.b32.xlu1 %v445_v32, %s1136_s9  ;;  %v403_v42 = vsel %vm1629_vm12, %v1259_v25, 0  ;;  %v1307_v43 = vpop.permute.xlu0 %404  ;;  %vm1628_vm5 = vcmp.ne.s16.totalorder %v1332_v51, 0  ;;  %vm542_vm12 = vcmask 1043456  }
  0x9d   : > { %vm1623_vm15 = vcmp.ne.s16.totalorder %v1307_v43, 0  ;;  %v486_v45 = vrot.slane %v403_v42, 6  ;;  %v402_v59 = vsel %vm1628_vm5, %v1256_v24, 0  ;;  %vm469_vm5 = vcmask 916480  }
  0x9e   : > { %452 = vrot.lane.b32.xlu0 %v447_v36, %s1136_s9  ;;  %v1311_v44 = vpop.permute.xlu1 %406  ;;  %v413_v46 = vsel %vm1623_vm15, %v1247_v20, 0  ;;  %v485_v61 = vrot.slane %v402_v59, 6 }
  0x9f   : > { %v499_v48 = vrot.slane %v413_v46, 4  ;;  %vm412_vm2 = vcmp.ne.s16.totalorder %v1311_v44, 0  ;;  %v1343_v56 = vsel %vm408_vm3, %v1307_v43, %v1311_v44 }
  0xa0   : > { %467 = vrot.lane.b32.xlu1 %v462_v38, %s1137_s13  ;;  %v415_v54 = vsel %vm412_vm2, %v1259_v25, 0  ;;  %vm411_vm11 = vcmp.ne.s16.totalorder %v1343_v56, 0  ;;  %v1360_v63 = vpop.permute.xlu0 %416 }
  0xa1   : > { %v501_v55 = vrot.slane %v415_v54, 4  ;;  %v414_v62 = vsel %vm411_vm11, %v1256_v24, 0  ;;  %vm1626_vm1 = vcmp.ne.s16.totalorder %v1360_v63, 0 }
  0xa2   : > { %463 = vrot.lane.b32.xlu0 %v460_v41, %s1137_s13  ;;  %v500_v1 = vrot.slane %v414_v62, 4  ;;  %v1363_v2 = vpop.permute.xlu1 %418  ;;  %v425_v5 = vsel %vm1626_vm1, %v1247_v20, 0  ;;  %vm1634_vm1 = vcmp.ne.s16.totalorder %v1238_v17, 0 }
  0xa3   : > { %v1368_v3 = vsel %vm420_vm0, %v1360_v63, %v1363_v2  ;;  %vm1624_vm15 = vcmp.ne.s16.totalorder %v1363_v2, 0  ;;  %vm1631_vm0 = vcmask 1039360   ;;  %v353_v41 = vsel %vm1634_vm1, %v1256_v24, 0 }
  0xa4   : > { %502 = vrot.lane.b32.xlu1 %v499_v48, %s1139_s15  ;;  %vm1625_vm3 = vcmp.ne.s16.totalorder %v1368_v3, 0  ;;  %v427_v7 = vsel %vm1624_vm15, %v1259_v25, 0  ;;  %vm1632_vm15 = vcmask 1031168   ;;  %vm1636_vm1 = vcmask 777216  }
  0xa5   : > { %v426_v6 = vsel %vm1625_vm3, %v1256_v24, 0  ;;  %vm1633_vm3 = vcmp.ne.s16.totalorder %v1241_v18, 0 }
  0xa6   : > { %491 = vrot.lane.b32.xlu0 %v486_v45, %s1138_s14  ;;  %v352_v38 = vsel %vm1633_vm3, %v1247_v20, 0  ;;  %vm478_vm3 = vcmask 908288  }
  0xa8   : > { %450 = vrot.lane.b32.xlu1 %v446_v53, %s1136_s9 }
  0xaa   : > { %487 = vrot.lane.b32.xlu0 %v484_v52, %s1138_s14 }
  0xac   : > { %518 = vrot.lane.b32.xlu1 %v513_v58, %s1140_s16 }
  0xae   : > { %506 = vrot.lane.b32.xlu0 %v501_v55, %s1139_s15 }
  0xb0   : > { %489 = vrot.lane.b32.xlu1 %v485_v61, %s1138_s14 }
  0xb2   : > { %465 = vrot.lane.b32.xlu0 %v461_v60, %s1137_s13 }
  0xb4   : > { %504 = vrot.lane.b32.xlu1 %v500_v1, %s1139_s15 }
  0xb6   : > { %516 = vrot.lane.b32.xlu0 %v512_v0, %s1140_s16 }
  0xb8   : > { %526 = vrot.lane.b32.xlu1 %v425_v5, %s1141_s17 }
  0xba   : > { %514 = vrot.lane.b32.xlu0 %v511_v4, %s1140_s16 }
  0xbc   : > { %530 = vrot.lane.b32.xlu1 %v427_v7, %s1141_s17 }
  0xbe   : > { %528 = vrot.lane.b32.xlu0 %v426_v6, %s1141_s17 }
  0xc2   : > { %574 = vperm.xlu0 %1057, %v570_v8  }
 0x102   : > { %v473_v9 = vpop.permute.xlu1 %472 }
 0x104   : > { %v434_v10 = vpop.permute.xlu0 %433 }
 0x106   : > { %v475_v11 = vpop.permute.xlu1 %474 }
 0x107   : > { %v479_v0 = vsel %vm478_vm3, %v473_v9, %v475_v11 }
 0x108   : > { %v477_v12 = vpop.permute.xlu0 %476 }
 0x109   : > { %v480_v57 = vsel %vm478_vm3, %v475_v11, %v477_v12 }
 0x10a   : > { %v438_v13 = vpop.permute.xlu1 %437 }
 0x10c   : > { %v436_v14 = vpop.permute.xlu0 %435 }
 0x10d   : > { %v440_v31 = vsel %vm1631_vm0, %v434_v10, %v436_v14  ;;  %v441_v32 = vsel %vm1631_vm0, %v436_v14, %v438_v13  ;;  %vm493_vm0 = vcmask 900096  }
 0x10e   : > { %v449_v15 = vpop.permute.xlu1 %448  ;;  %v538_v42 = vsel %vm535_vm13, %v352_v38, %v440_v31  ;;  %v541_v45 = vsel %vm535_vm13, %v353_v41, %v441_v32 }
 0x110   : > { %v453_v16 = vpop.permute.xlu0 %452 }
 0x112   : > { %v468_v21 = vpop.permute.xlu1 %467 }
 0x114   : > { %v464_v19 = vpop.permute.xlu0 %463 }
 0x116   : > { %v503_v26 = vpop.permute.xlu1 %502 }
 0x118   : > { %v492_v23 = vpop.permute.xlu0 %491 }
 0x11a   : > { %v451_v29 = vpop.permute.xlu1 %450 }
 0x11b   : > { %v455_v36 = vsel %vm1632_vm15, %v449_v15, %v451_v29  ;;  %v456_v37 = vsel %vm1632_vm15, %v451_v29, %v453_v16  ;;  %vm1635_vm15 = vcmask 785408  }
 0x11c   : > { %v488_v25 = vpop.permute.xlu0 %487  ;;  %v546_v52 = vsel %vm542_vm12, %v541_v45, %v456_v37  ;;  %v544_v20 = vsel %vm542_vm12, %v538_v42, %v455_v36 }
 0x11e   : > { %v519_v34 = vpop.permute.xlu1 %518 }
 0x120   : > { %v507_v30 = vpop.permute.xlu0 %506 }
 0x122   : > { %v490_v49 = vpop.permute.xlu1 %489 }
 0x123   : > { %v495_v54 = vsel %vm493_vm0, %v490_v49, %v492_v23  ;;  %v494_v58 = vsel %vm493_vm0, %v488_v25, %v490_v49 }
 0x124   : > { %v466_v46 = vpop.permute.xlu0 %465  ;;  %v559_v60 = vsel %vm535_vm13, %v480_v57, %v495_v54  ;;  %v556_v5 = vsel %vm535_vm13, %v479_v0, %v494_v58 }
 0x125   : > { %v470_v47 = vsel %vm469_vm5, %v464_v19, %v466_v46  ;;  %v471_v48 = vsel %vm469_vm5, %v466_v46, %v468_v21  ;;  %v1060_v19 = vld [vmem:[%s1616_s1] sm:$0xff]  }
 0x126   : > { %v552_v53 = vsel %vm547_vm4, %v546_v52, %v471_v48  ;;  %v549_v24 = vsel %vm547_vm4, %v544_v20, %v470_v47  ;;  %v505_v59 = vpop.permute.xlu1 %504  ;;  %v663_v46 = vld [vmem:[%s1618_s3] sm:$0xf] }
 0x127   : > { %597 = vmatprep.subr.bf16.mxu0 %v552_v53  ;;  %v509_v61 = vsel %vm1635_vm15, %v503_v26, %v505_v59  ;;  %v510_v62 = vsel %vm1635_vm15, %v505_v59, %v507_v30  ;;  %vm532_vm15 = vcmask 769024   ;;  %v671_v47 = vld [vmem:[%s1619_s4] sm:$0xf] }
 0x128   : > { %v517_v55 = vpop.permute.xlu0 %516  ;;  %598 = vmatpush1.bf16.msra.mxu0 %v549_v24  ;;  %v563_v4 = vsel %vm542_vm12, %v559_v60, %v510_v62  ;;  %v561_v12 = vsel %vm542_vm12, %v556_v5, %v509_v61 }
 0x129   : > { %v522_v1 = vsel %vm1636_vm1, %v517_v55, %v519_v34 }
 0x12a   : > { %v568_v7 = vsel %vm547_vm4, %v563_v4, %v522_v1  ;;  %v527_v10 = vpop.permute.xlu1 %526 }
 0x12b   : > { %599 = vmatprep.subr.bf16.mxu0 %v568_v7 }
 0x12c   : > { %v515_v6 = vpop.permute.xlu0 %514 }
 0x12d   : > { %v521_v8 = vsel %vm1636_vm1, %v515_v6, %v517_v55  ;;  %vm587_vm1 = vcmask 293888  }
 0x12e   : > { %v565_v13 = vsel %vm547_vm4, %v561_v12, %v521_v8  ;;  %v531_v14 = vpop.permute.xlu1 %530 }
 0x12f   : > { %600 = vmatpush1.bf16.msra.mxu0 %v565_v13 }
 0x130   : > { %v529_v9 = vpop.permute.xlu0 %528 }
 0x131   : > { %v533_v11 = vsel %vm532_vm15, %v527_v10, %v529_v9  ;;  %v534_v15 = vsel %vm532_vm15, %v529_v9, %v531_v14 }
 0x132   : > { %v592_v16 = vsel %vm535_vm13, %v533_v11, 0  ;;  %992 = vmatprep.subr.msk.bf16.mxu0 %vm535_vm13, %v534_v15 }
 0x133   : > { %602 = vmatpush1.bf16.msra.mxu0 %v592_v16 }
 0x136   : > { %993 = vmatmul.mubr.msk.bf16.vlgmr.msra.gmra.mrb[0].mxu0 %vm587_vm1, %v1060_v19  ;;  %vm1647_vm1 = vcmask 1039360  }
 0x141   : > { %v575_v21 = vpop.permute.xlu0 %574 }
 0x209   : > { %v631_v23 = vpop.f32.mrb[0].mxu0 }
 0x20a   : > { %v632_v26 = vadd.f32 %v631_v23, %v575_v21  ;;  %v633_v25 = vpop.f32.mrb[1].mxu0 }
 0x20b   : > { %v634_v29 = vadd.f32 %v633_v25, %v575_v21  ;;  %v1432_v30 = vpop.f32.mrb[2].mxu0 }
 0x20c   : > { %v1434_v31 = vpop.f32.mrb[3].mxu0  ;;  %v640_v32 = vsel %vm542_vm12, %v632_v26, 0.0  ;;  %v646_v34 = vmul.f32 %v632_v26, %v632_v26 }
 0x20d   : > { %v641_v36 = vsel %vm542_vm12, %v634_v29, 0.0  ;;  %v647_v37 = vmul.f32 %v634_v29, %v634_v29 }
 0x20e   : > { %v642_v38 = vadd.f32 %v641_v36, %v640_v32  ;;  %v648_v41 = vsel %vm542_vm12, %v646_v34, 0.0 }
 0x20f   : > { %v649_v42 = vsel %vm542_vm12, %v647_v37, 0.0 }
 0x210   : > { %643 = vadd.xlane.f32.xlu1 %v642_v38  ;;  %v650_v45 = vadd.f32 %v649_v42, %v648_v41 }
 0x212   : > { %651 = vadd.xlane.f32.xlu0 %v650_v45 }
 0x221   : > { %666 = vperm.xlu1 %1058, %v663_v46  }
 0x228   : > { %674 = vperm.xlu0 %1057, %v671_v47   ;;  %v571_v47 = vld [vmem:[%s1617_s2 + $0x8] sm:$0xff] }
 0x29d   : > { %v644_v48 = vpop.xlane.xlu1 %643 }
 0x29e   : > { %v645_v49 = vmul.f32 0.00390625, %v644_v48 }
 0x29f   : > { %v652_v52 = vpop.xlane.xlu0 %651 }
 0x2a0   : > { %v653_v20 = vmul.f32 0.00390625, %v652_v52  ;;  %v654_v53 = vmul.f32 %v645_v49, %v645_v49  ;;  %v657_v57 = vsub.f32 %v632_v26, %v645_v49  ;;  %v658_v58 = vsub.f32 %v634_v29, %v645_v49 }
 0x2a1   : > { %v667_v60 = vpop.permute.xlu1 %666 }
 0x2a2   : > { %v655_v24 = vsub.f32 %v653_v20, %v654_v53 }
 0x2a4   : > { %v656_v54 = vmax.f32 %v655_v24, 0.0 }
 0x2a6   : > { %v659_v55 = vadd.f32 1e-05, %v656_v54 }
 0x2a7   : > { %v675_v4 = vpop.permute.xlu0 %674 }
 0x2a8   : > { %1061 = vrsqrt.f32 %v659_v55 }
 0x2b2   : > { %v1062_v59 = vpop.eup %1061 }
 0x2b3   : > { %v661_v61 = vmul.f32 %v1062_v59, %v657_v57  ;;  %v662_v62 = vmul.f32 %v1062_v59, %v658_v58 }
 0x2b5   : > { %v669_v0 = vmul.f32 %v667_v60, %v661_v61  ;;  %v670_v1 = vmul.f32 %v667_v60, %v662_v62 }
 0x2b7   : > { %v677_v5 = vadd.f32 %v675_v4, %v669_v0  ;;  %v678_v6 = vadd.f32 %v675_v4, %v670_v1 }
 0x2b9   : > { %v679_v7 = vsel %vm542_vm12, %v677_v5, %v632_v26  ;;  %v680_v8 = vsel %vm542_vm12, %v678_v6, %v634_v29 }
 0x2ba   : > { %vm681_vm13 = vcmp.ge.f32.partialorder %v679_v7, 0.0  ;;  %v683_v10 = vmul.f32 0.2, %v679_v7  ;;  %v684_v12 = vmul.f32 0.2, %v680_v8  ;;  %vm682_vm4 = vcmp.ge.f32.partialorder %v680_v8, 0.0 }
 0x2bc   : > { %v685_v13 = vsel %vm681_vm13, %v679_v7, %v683_v10  ;;  %v686_v11 = vsel %vm682_vm4, %v680_v8, %v684_v12  ;;  %vm1648_vm13 = vmmov %vm1647_vm1  ;;  %vm1649_vm4 = vcmp.ne.s16.totalorder %v1238_v17, 0 }
 0x2bd   : > { %v688_v9 = vpack.c.bf16 %v685_v13, %v685_v13  ;;  %v689_v14 = vpack.c.bf16 %v686_v11, %v686_v11 }
 0x2bf   : > { %692 = vrot.lane.b32.xlu1 %v688_v9, %s1128_s18 }
 0x2c3   : > { %694 = vrot.lane.b32.xlu1 %v689_v14, %s1128_s18 }
 0x331   : > { %v693_v15 = vpop.permute.xlu1 %692 }
 0x332   : > { %v1458_v23 = vsel %vm325_vm6, 0, %v693_v15 }
 0x333   : > { %v706_v27 = vsel %vm374_vm7, %v1458_v23, 0  ;;  %v723_v44 = vrot.slane %v1458_v23, 4  ;;  %v709_v37 = vsel %vm386_vm10, %v1458_v23, 0  ;;  %vm1640_vm7 = vcmp.ne.s16.totalorder %v1288_v35, 0 }
 0x334   : > { %v748_v38 = vrot.slane %v709_v37, 4  ;;  %vm1643_vm10 = vcmp.ne.s16.totalorder %v1307_v43, 0 }
 0x335   : > { %v695_v16 = vpop.permute.xlu1 %694 }
 0x336   : > { %v1451_v19 = vsel %vm325_vm6, %v693_v15, %v695_v16  ;;  %v702_v21 = vsel %vm325_vm6, %v695_v16, 0  ;;  %vm1639_vm6 = vcmp.ne.s16.totalorder %v1327_v50, 0 }
 0x337   : > { %763 = vrot.lane.b32.xlu0 %v702_v21, %s1134_s29  ;;  %761 = vrot.lane.b32.xlu1 %v1451_v19, %s1134_s29  ;;  %v708_v26 = vsel %vm376_vm8, %v702_v21, 0  ;;  %v717_v25 = vsel %vm412_vm2, %v702_v21, 0  ;;  %v707_v29 = vsel %vm375_vm14, %v1451_v19, 0  ;;  %v724_v32 = vrot.slane %v1451_v19, 4 }
 0x338   : > { %v716_v40 = vsel %vm411_vm11, %v1451_v19, 0  ;;  %v725_v34 = vrot.slane %v702_v21, 4  ;;  %v711_v36 = vsel %vm388_vm9, %v702_v21, 0  ;;  %v710_v56 = vsel %vm1639_vm6, %v1451_v19, 0 }
 0x339   : > { %v750_v22 = vrot.slane %v711_v36, 4  ;;  %v749_v28 = vrot.slane %v710_v56, 4  ;;  %v714_v41 = vsel %vm1640_vm7, %v702_v21, 0  ;;  %vm1641_vm8 = vcmp.ne.s16.totalorder %v1332_v51, 0 }
 0x33a   : > { %v713_v42 = vsel %vm1641_vm8, %v1451_v19, 0  ;;  %v772_v33 = vrot.slane %v714_v41, 4  ;;  %vm1642_vm9 = vcmp.ne.s16.totalorder %v1295_v39, 0  ;;  %v715_v51 = vsel %vm1643_vm10, %v1458_v23, 0 }
 0x33b   : > { %741 = vrot.lane.b32.xlu0 %v708_v26, %s1136_s9  ;;  %759 = vrot.lane.b32.xlu1 %v1458_v23, %s1134_s29  ;;  %v771_v50 = vrot.slane %v713_v42, 4  ;;  %v712_v45 = vsel %vm1642_vm9, %v1458_v23, 0  ;;  %vm1644_vm14 = vcmp.ne.s16.totalorder %v1360_v63, 0  ;;  %vm1645_vm2 = vcmp.ne.s16.totalorder %v1368_v3, 0  ;;  %v843_v63 = vld [vmem:[%s1621_s6] sm:$0xff]  ;;  %s1142_s29 = smov [#allocation2]  }
 0x33c   : > { %v770_v35 = vrot.slane %v712_v45, 4  ;;  %v718_v46 = vsel %vm1644_vm14, %v1458_v23, 0  ;;  %v719_v39 = vsel %vm1645_vm2, %v1451_v19, 0  ;;  %vm1646_vm11 = vcmp.ne.s16.totalorder %v1363_v2, 0  ;;  %v687_v42 = vld [vmem:[%s1620_s5] sm:$0xf] }
 0x33d   : > { %v720_v43 = vsel %vm1646_vm11, %v702_v21, 0  ;;  %v705_v61 = vsel %vm1649_vm4, %v1451_v19, 0  ;;  %vm1650_vm6 = vcmp.ne.s16.totalorder %v1241_v18, 0  ;;  %vm1651_vm7 = vcmask 1031168  }
 0x33e   : > { %v704_v0 = vsel %vm1650_vm6, %v1458_v23, 0  ;;  %vm1652_vm8 = vmmov %vm1651_vm7  ;;  %vm1653_vm9 = vcmask 777216  }
 0x33f   : > { %788 = vrot.lane.b32.xlu0 %v717_v25, %s1139_s15  ;;  %739 = vrot.lane.b32.xlu1 %v707_v29, %s1136_s9  ;;  %vm1656_vm14 = vmmov %vm1653_vm9 }
 0x343   : > { %728 = vrot.lane.b32.xlu0 %v724_v32, %s1135_s8  ;;  %737 = vrot.lane.b32.xlu1 %v706_v27, %s1136_s9 }
 0x347   : > { %726 = vrot.lane.b32.xlu0 %v723_v44, %s1135_s8  ;;  %786 = vrot.lane.b32.xlu1 %v716_v40, %s1139_s15 }
 0x34b   : > { %796 = vrot.lane.b32.xlu0 %v725_v34, %s1140_s16  ;;  %730 = vrot.lane.b32.xlu1 %v725_v34, %s1135_s8  ;;  %s1067_s8 = sshll.u32 %s1142_s29, 4  ;;  %s1068_s8 = int_to_ptr.vmem [resolvable:$false] %s1067_s8 }
 0x34c   : > { %s1069_s9 = scalar_lea.vmem %s1068_s8, 512 }
 0x34f   : > { %755 = vrot.lane.b32.xlu0 %v750_v22, %s1137_s13  ;;  %794 = vrot.lane.b32.xlu1 %v724_v32, %s1140_s16 }
 0x353   : > { %751 = vrot.lane.b32.xlu0 %v748_v38, %s1137_s13  ;;  %753 = vrot.lane.b32.xlu1 %v749_v28, %s1137_s13 }
 0x357   : > { %777 = vrot.lane.b32.xlu0 %v772_v33, %s1138_s14  ;;  %775 = vrot.lane.b32.xlu1 %v771_v50, %s1138_s14 }
 0x35b   : > { %773 = vrot.lane.b32.xlu0 %v770_v35, %s1138_s14  ;;  %784 = vrot.lane.b32.xlu1 %v715_v51, %s1139_s15  ;;  %s269_s15 = sand.u32 1, %s1117_s25  }
 0x35f   : > { %792 = vrot.lane.b32.xlu0 %v723_v44, %s1140_s16  ;;  %803 = vrot.lane.b32.xlu1 %v718_v46, %s1141_s17  ;;  %s988_s16 = sshll.u32 %s269_s15, 4 }
 0x360   : > { %s271_s22 = scalar_lea.vmem [#allocation2], %s988_s16 }
 0x361   : > { %s925_s23 = sshll.u32 %s271_s22, 4  ;;  %s1575_s23 = int_to_ptr.vmem [resolvable:$true] %s925_s23 }
 0x362   : > { %s1063_s18 = scalar_lea.vmem %s1575_s23, 256  ;;  %p1070_p0 = scmp.lt.s32.totalorder %s1575_s23, %s1068_s8 }
 0x363   : > { %805 = vrot.lane.b32.xlu0 %v719_v39, %s1141_s17  ;;  %807 = vrot.lane.b32.xlu1 %v720_v43, %s1141_s17  ;;  %s1002_s17 = sshll.u32 %s1204_s28, 8  ;;  %s911_s28 = scalar_lea.sflag [#allocation3], %s269_s15 }
 0x364   : > { %s1573_s21 = scalar_lea.hbm %s1622_s7, %s1002_s17  ;;  %p1064_p11 = scmp.ne.s32.totalorder %s1575_s23, %s1063_s18 }
 0x365   : > { %p1071_p1 = scmp.lt.s32.totalorder %s1069_s9, %s1063_s18 }
 0x366   : > { %p1065_p12 = pnand %p1064_p11, %p1221_p5 }
 0x367   : > { %846 = vperm.xlu0 %1057, %v843_v63   ;;  %579 = vperm.xlu1 %1058, %v571_v47   ;;  %p1072_p2 = por %p1071_p1, %p1070_p0 }
 0x368   : > { %p1066_p13 = pneg %p1065_p12 }
 0x36a   : > { %p1073_p3 = pnand %p1072_p2, %p1066_p13 }
 0x3a9   : > { %v764_v48 = vpop.permute.xlu0 %763  ;;  %v762_v3 = vpop.permute.xlu1 %761 }
 0x3aa   : > { %v766_v14 = vsel %vm478_vm3, %v762_v3, %v764_v48 }
 0x3ad   : > { %v742_v49 = vpop.permute.xlu0 %741  ;;  %v760_v52 = vpop.permute.xlu1 %759 }
 0x3ae   : > { %v765_v26 = vsel %vm478_vm3, %v760_v52, %v762_v3  ;;  %vm849_vm3 = vcmask 588800  }
 0x3b1   : > { %v789_v2 = vpop.permute.xlu0 %788  ;;  %v740_v20 = vpop.permute.xlu1 %739 }
 0x3b2   : > { %v744_v8 = vsel %vm1651_vm7, %v740_v20, %v742_v49 }
 0x3b5   : > { %v729_v53 = vpop.permute.xlu0 %728  ;;  %v738_v24 = vpop.permute.xlu1 %737 }
 0x3b6   : > { %v743_v10 = vsel %vm1652_vm8, %v738_v24, %v740_v20 }
 0x3b9   : > { %v727_v54 = vpop.permute.xlu0 %726  ;;  %v787_v55 = vpop.permute.xlu1 %786 }
 0x3ba   : > { %v732_v57 = vsel %vm1647_vm1, %v727_v54, %v729_v53 }
 0x3bb   : > { %v813_v1 = vsel %vm542_vm12, %v704_v0, %v732_v57 }
 0x3bd   : > { %v797_v58 = vpop.permute.xlu0 %796  ;;  %v731_v59 = vpop.permute.xlu1 %730 }
 0x3be   : > { %v733_v60 = vsel %vm1648_vm13, %v729_v53, %v731_v59 }
 0x3bf   : > { %v817_v62 = vsel %vm542_vm12, %v705_v61, %v733_v60 }
 0x3c0   : > { %859 = vmatprep.subr.bf16.mxu1 %v817_v62 }
 0x3c1   : > { %v756_v4 = vpop.permute.xlu0 %755  ;;  %v795_v5 = vpop.permute.xlu1 %794  ;;  %860 = vmatpush1.bf16.msra.mxu1 %v813_v1 }
 0x3c2   : > { %v799_v19 = vsel %vm1653_vm9, %v795_v5, %v797_v58 }
 0x3c5   : > { %v752_v6 = vpop.permute.xlu0 %751  ;;  %v754_v7 = vpop.permute.xlu1 %753 }
 0x3c6   : > { %v757_v17 = vsel %vm469_vm5, %v752_v6, %v754_v7  ;;  %v758_v12 = vsel %vm469_vm5, %v754_v7, %v756_v4  ;;  %vm1654_vm5 = vcmask 785408  }
 0x3c7   : > { %v825_v13 = vsel %vm542_vm12, %v744_v8, %v758_v12  ;;  %v821_v18 = vsel %vm542_vm12, %v743_v10, %v757_v17  ;;  %v791_v29 = vsel %vm1654_vm5, %v787_v55, %v789_v2  ;;  %vm1655_vm10 = vmmov %vm1654_vm5 }
 0x3c8   : > { %861 = vmatprep.subr.bf16.mxu1 %v825_v13  ;;  %v841_v27 = vsel %vm542_vm12, %v791_v29, %v799_v19 }
 0x3c9   : > { %v778_v9 = vpop.permute.xlu0 %777  ;;  %v776_v11 = vpop.permute.xlu1 %775  ;;  %862 = vmatpush1.bf16.msra.mxu1 %v821_v18 }
 0x3ca   : > { %v780_v15 = vsel %vm493_vm0, %v776_v11, %v778_v9 }
 0x3cb   : > { %v833_v16 = vsel %vm542_vm12, %v766_v14, %v780_v15 }
 0x3cc   : > { %863 = vmatprep.subr.bf16.mxu1 %v833_v16 }
 0x3cd   : > { %v774_v21 = vpop.permute.xlu0 %773  ;;  %v785_v23 = vpop.permute.xlu1 %784 }
 0x3ce   : > { %v779_v25 = vsel %vm493_vm0, %v774_v21, %v776_v11  ;;  %v790_v34 = vsel %vm1655_vm10, %v785_v23, %v787_v55 }
 0x3cf   : > { %v829_v32 = vsel %vm542_vm12, %v765_v26, %v779_v25 }
 0x3d0   : > { %864 = vmatpush1.bf16.msra.mxu1 %v829_v32 }
 0x3d1   : > { %v793_v44 = vpop.permute.xlu0 %792  ;;  %v804_v40 = vpop.permute.xlu1 %803  ;;  %865 = vmatprep.subr.bf16.mxu1 %v841_v27 }
 0x3d2   : > { %v798_v36 = vsel %vm1656_vm14, %v793_v44, %v795_v5 }
 0x3d3   : > { %v837_v22 = vsel %vm542_vm12, %v790_v34, %v798_v36 }
 0x3d4   : > { %866 = vmatpush1.bf16.msra.mxu1 %v837_v22 }
 0x3d5   : > { %v806_v37 = vpop.permute.xlu0 %805  ;;  %v808_v56 = vpop.permute.xlu1 %807 }
 0x3d6   : > { %v809_v38 = vsel %vm532_vm15, %v804_v40, %v806_v37  ;;  %v810_v28 = vsel %vm532_vm15, %v806_v37, %v808_v56 }
 0x3d7   : > { %994 = vmatprep.subr.msk.bf16.mxu1 %vm542_vm12, %v810_v28  ;;  %v854_v41 = vsel %vm542_vm12, %v809_v38, 0 }
 0x3d8   : > { %868 = vmatpush1.bf16.msra.mxu1 %v854_v41 }
 0x3db   : > { %995 = vmatmul.mubr.msk.bf16.vlgmr.msra.gmra.mrb[0].mxu1 %vm849_vm3, %v687_v42 }
 0x3e6   : > { %v847_v33 = vpop.permute.xlu0 %846  ;;  %v580_v45 = vpop.permute.xlu1 %579 }
 0x3e7   : > { %v636_v47 = vadd.f32 %v1432_v30, %v580_v45  ;;  %v638_v3 = vadd.f32 %v1434_v31, %v580_v45 }
 0x4ae   : > { %v893_v50 = vpop.f32.mrb[0].mxu1 }
 0x4af   : > { %v894_v35 = vadd.f32 %v893_v50, %v847_v33  ;;  %v895_v51 = vpop.f32.mrb[1].mxu1 }
 0x4b0   : > { %v896_v46 = vadd.f32 %v895_v51, %v847_v33  ;;  %v897_v39 = vpop.f32.mrb[2].mxu1 }
 0x4b1   : > { %vm900_vm15 = vcmp.ge.f32.partialorder %v894_v35, 0.0  ;;  %v902_v43 = vmul.f32 0.2, %v894_v35  ;;  %v898_v63 = vpop.f32.mrb[3].mxu1 }
 0x4b2   : > { %vm901_vm12 = vcmp.ge.f32.partialorder %v896_v46, 0.0  ;;  %v903_v48 = vmul.f32 0.2, %v896_v46 }
 0x4b3   : > { %v904_v49 = vsel %vm900_vm15, %v894_v35, %v902_v43 }
 0x4b4   : > { %v906_v52 = vadd.f32 %v904_v49, %v636_v47  ;;  %v905_v2 = vsel %vm901_vm12, %v896_v46, %v903_v48 }
 0x4b5   : > { %v907_v20 = vadd.f32 %v905_v2, %v638_v3 }
 0x4b6   : > { %908 = vst [vmem:[%s271_s22] sm:$0xff] %v906_v52 }
 0x4b7   : > { %909 = vst [vmem:[%s271_s22 + $0x8] sm:$0xff] %v907_v20 }
 0x4b8   : > { %1076 = shalt.err (!%p1073_p3)
}
 0x4b9   : > { %s1077_s13 = scalar_lea.hbm %s1573_s21, 256  ;;  %s1081_s16 = scalar_lea.hbm %s1622_s7, 512 }
 0x4ba   : > { %p1078_p4 = scmp.ne.s32.totalorder %s1573_s21, %s1077_s13  ;;  %p1082_p9 = scmp.lt.u32.totalorder %s1573_s21, %s1622_s7 }
 0x4bb   : > { %p1083_p10 = scmp.lt.u32.totalorder %s1081_s16, %s1077_s13  ;;  %p1085_p12 = scmp.lt.u32.totalorder %s1077_s13, %s1573_s21 }
 0x4bc   : > { %p1079_p7 = pnand %p1078_p4, %p1221_p5 }
 0x4bd   : > { %p1084_p11 = por %p1083_p10, %p1082_p9 }
 0x4be   : > { %p1080_p8 = pneg %p1079_p7 }
 0x4bf   : > { %p1086_p13 = por %p1085_p12, %p1084_p11 }
 0x4c1   : > { %p1087_p0 = pnand %p1086_p13, %p1080_p8 }
 0x4c3   : > { %1090 = shalt.err (!%p1087_p0)
}
 0x4c4   : > { %1003 = dma.vmem_to_hbm [thread:$0]  (%p1221_p5), %s1575_s23, 256, %s1573_s21, %s911_s28  }
 0x4c5 PF: > { %p1009_p1 = scmp.ge.s32.totalorder %s1125_s27, 2  ;;  %s937_s19 = sand.u32 1, %s1113_s24  }
 0x4c6   : > { %s938_s20 = scalar_lea.sflag [#allocation3], %s937_s19 }
 0x4c7   : > { %p1006_p2 = pnand %p1009_p1, %p1225_p6 }
 0x4c9   : > { %1108 = dma.done.wait (!%p1006_p2), %s938_s20, 256  }
 0x4ca   : > { %1110 = vsyncadd (!%p1006_p2), %s938_s20, 4294967040  ;;  %p17_p3 = scmp.ge.s32.totalorder %s1208_s30, 4   ;;  %s1657_s24 = smov %s1117_s25 }
 0x4cb   : > { %s1658_s25 = smov %s1121_s26  ;;  %s1659_s26 = smov %s1219_s10 }
 0x4cc   : > { %s1660_s27 = smov %s1208_s30  ;;  %19 = sbr.rel (!%p17_p3) target bundleno = 3 (0x3), region = 83 }
 0x4d3   :  { %943 = vsyncpa [#allocation3], 1 }
 0x4d4   :  { %945 = vsyncpa [#allocation3 + $0x1], 1 }

</bundles_post_ra>
